<compile_context>
chip_gen: v6e
topology: v6e:2x2x1
jax: 0.10.0
libtpu: 0.0.40
codegen_flags: <defaults>
</compile_context>

<pallas_src>
import jax
import jax.numpy as jnp
from jax import lax
from jax.experimental import pallas as pl
from jax.experimental.pallas import tpu as pltpu

LN_EPS = 1e-5  # torch.nn.LayerNorm default eps


def embeddings_kernel(xid_ref, seq_ref, tok_tab_ref, tmpl_tab_ref, savg_ref,
                      bias_ref, gamma_ref, beta_ref, o_ref):
    """One grid step: TM packed rows, each holding P tokens of D lanes (P*D = 128).

    xid_ref:      (TM, P)      int32 token ids (token slot t -> lanes [t*D,(t+1)*D))
    seq_ref:      (TM, P*L)    int32 template ids, L per token slot
    tok_tab_ref:  (P, V, 128)  token_W placed in lane block t (slot-specific)
    tmpl_tab_ref: (P, TV, 128) bias_scale * (template_W @ proj_W) in lane block t
    savg_ref:     (128, 128)   block-diagonal averaging matrix (1/D in DxD blocks)
    bias_ref:     (1, 128)     bias_scale * L * proj_b, tiled per token slot
    gamma_ref:    (1, 128)     LayerNorm gamma, tiled per token slot
    beta_ref:     (1, 128)     LayerNorm beta,  tiled per token slot
    o_ref:        (TM, 128)    output, lane-dense (P tokens per row)
    """
    TM = xid_ref.shape[0]
    P, V, W = tok_tab_ref.shape
    TV = tmpl_tab_ref.shape[1]
    L = seq_ref.shape[1] // P
    f32 = jnp.float32

    xid = xid_ref[...]                                     # (TM, P)
    seq = seq_ref[...]                                     # (TM, P*L)
    iota_v = lax.broadcasted_iota(jnp.int32, (TM, V), 1)
    iota_tv = lax.broadcasted_iota(jnp.int32, (TM, TV), 1)

    y = jnp.zeros((TM, W), f32)
    for t in range(P):                                     # static, unrolled (P == 4)
        # Token-embedding gather as one-hot @ table (MXU). The table already
        # lives in this slot's lane block, so summation assembles the packed
        # row without any lane shuffles.
        oh = (xid[:, t:t + 1] == iota_v).astype(f32)       # (TM, V)
        y = y + jnp.dot(oh, tok_tab_ref[t], preferred_element_type=f32)

        # Template gather + sum over L as an occurrence-count matmul against
        # the bias_scale-scaled, pre-projected template table. The L-reduction
        # is L full-tile VPU adds (no cross-sublane reduction).
        cnt = jnp.zeros((TM, TV), f32)
        for l in range(L):                                 # static, unrolled (L == 4)
            cnt = cnt + (seq[:, t * L + l:t * L + l + 1] == iota_tv).astype(f32)
        y = y + jnp.dot(cnt, tmpl_tab_ref[t], preferred_element_type=f32)

    y = y + bias_ref[...]                                  # + bias_scale * L * proj_b

    # Per-token LayerNorm (over each D-lane segment) via block-diagonal
    # averaging matmul -> MXU, no segmented lane reductions needed.
    savg = savg_ref[...]
    mean = jnp.dot(y, savg, preferred_element_type=f32)
    d = y - mean
    var = jnp.dot(d * d, savg, preferred_element_type=f32)
    yn = d * lax.rsqrt(var + LN_EPS)
    o_ref[...] = (yn * gamma_ref[...] + beta_ref[...]).astype(o_ref.dtype)
    # TODO(synk): dropout is identity (eval mode); positional embedding is
    # disabled by default (ape_class=None) and there is no `embed_scale` attr.


def _round_up(x, m):
    return (x + m - 1) // m * m


def embeddings_forward(x_ids, seq_ids, params, *, tile_rows=512):
    """x_ids: (B, S) int32; seq_ids: (B, S, L) int32 -> (B, S, D) float32."""
    B, S = x_ids.shape
    L = seq_ids.shape[-1]
    token_W = params["token_W"]
    template_W = params["template_W"]
    V, D = token_W.shape
    TV = template_W.shape[0]
    assert D <= 128 and 128 % D == 0, "packed layout assumes D divides 128"
    # TODO(synk): for D not dividing 128, fall back to a (tm, D) layout.
    P = 128 // D
    LANES = 128

    # ---- constant folding (one-time, plain XLA) ------------------------------
    # NOTE: proj_W is stored [in, out]; torch Linear weights ([out, in]) must be
    # transposed when importing real checkpoints.
    scale = params["bias_scale"].reshape(())
    proj_b = params["proj_b"].reshape(1, D)
    t_proj = scale * (template_W @ params["proj_W"])           # (TV, D)
    b_const = scale * jnp.float32(L) * proj_b                  # (1, D)

    def _place(mat, t):                                        # (R, D) -> (R, 128)
        return jnp.pad(mat, ((0, 0), (t * D, LANES - (t + 1) * D)))

    tok_tab = jnp.stack([_place(token_W, t) for t in range(P)])    # (P, V, 128)
    tmpl_tab = jnp.stack([_place(t_proj, t) for t in range(P)])    # (P, TV, 128)

    lane = jnp.arange(LANES)
    savg = ((lane[:, None] // D) == (lane[None, :] // D)).astype(jnp.float32) / D

    bias128 = jnp.tile(b_const, (1, P))
    gamma128 = jnp.tile(params["ln_gamma"].reshape(1, D), (1, P))
    beta128 = jnp.tile(params["ln_beta"].reshape(1, D), (1, P))

    # ---- id packing: P tokens per 128-lane row --------------------------------
    M = B * S
    Mp = pl.cdiv(M, P)
    Mp_pad = _round_up(max(Mp, 16), 16)
    tr = min(tile_rows, Mp_pad // 2)        # keep >= 2 grid steps (v7x has 2 TCs)
    tr = max(8, (tr // 8) * 8)              # (8,128) sublane alignment
    Mp_pad = _round_up(Mp_pad, tr)
    grid = Mp_pad // tr
    M_pad = Mp_pad * P

    x_flat = jnp.pad(x_ids.reshape(M).astype(jnp.int32), (0, M_pad - M))
    seq_flat = jnp.pad(seq_ids.reshape(M, L).astype(jnp.int32),
                       ((0, M_pad - M), (0, 0)))
    xid_p = x_flat.reshape(Mp_pad, P)
    seq_p = seq_flat.reshape(Mp_pad, P * L)

    out_packed = pl.pallas_call(
        embeddings_kernel,
        out_shape=jax.ShapeDtypeStruct((Mp_pad, LANES), jnp.float32),
        grid_spec=pltpu.PrefetchScalarGridSpec(
            num_scalar_prefetch=0,
            grid=(grid,),
            in_specs=[
                pl.BlockSpec((tr, P), lambda i: (i, 0)),             # token ids
                pl.BlockSpec((tr, P * L), lambda i: (i, 0)),         # template ids
                pl.BlockSpec((P, V, LANES), lambda i: (0, 0, 0)),    # token table (VMEM resident)
                pl.BlockSpec((P, TV, LANES), lambda i: (0, 0, 0)),   # projected template table
                pl.BlockSpec((LANES, LANES), lambda i: (0, 0)),      # LN averaging matrix
                pl.BlockSpec((1, LANES), lambda i: (0, 0)),          # folded proj bias
                pl.BlockSpec((1, LANES), lambda i: (0, 0)),          # LN gamma
                pl.BlockSpec((1, LANES), lambda i: (0, 0)),          # LN beta
            ],
            out_specs=pl.BlockSpec((tr, LANES), lambda i: (i, 0)),
        ),
        compiler_params=pltpu.CompilerParams(
            dimension_semantics=("parallel",)),
    )(xid_p, seq_p, tok_tab, tmpl_tab, savg, bias128, gamma128, beta128)

    # Unpack: packed row r holds tokens r*P .. r*P+P-1, D lanes each.
    return out_packed.reshape(Mp_pad * P, D)[:M].reshape(B, S, D)


def make_params(key, *, vocab_size, tok_vocab_size, embed_dim):
    k_tok, k_tmpl, k_w, k_b = jax.random.split(key, 4)

    # token_embedding: normal(0, embed_dim**-0.5), padding_idx=0 row zeroed.
    token_W = jax.random.normal(k_tok, (vocab_size, embed_dim), jnp.float32) \
              * (embed_dim ** -0.5)
    token_W = token_W.at[0].set(0.0)

    # template_embed: standard normal (nn.Embedding default init).
    template_W = jax.random.normal(k_tmpl, (tok_vocab_size, embed_dim), jnp.float32)

    # bias_proj: Linear(D, D); weight stored as [in, out].
    bound = embed_dim ** -0.5
    proj_W = jax.random.uniform(k_w, (embed_dim, embed_dim), jnp.float32,
                                minval=-bound, maxval=bound)
    proj_b = jax.random.uniform(k_b, (1, embed_dim), jnp.float32,
                                minval=-bound, maxval=bound)

    return {
        "token_W": token_W,
        "template_W": template_W,
        "proj_W": proj_W,
        "proj_b": proj_b,
        "ln_gamma": jnp.ones((1, embed_dim), jnp.float32),
        "ln_beta": jnp.zeros((1, embed_dim), jnp.float32),
        "bias_scale": jnp.full((1,), 0.1, jnp.float32),   # bias_scale_init default 0.1
    }


def reference_forward(x_ids, seq_ids, params):
    """Pure-JAX reference mirroring the torch forward (eval mode)."""
    D = params["token_W"].shape[1]
    tok = params["token_W"][x_ids]                                   # (B,S,D)
    tmpl = params["template_W"][seq_ids]                             # (B,S,L,D)
    eb = jnp.einsum("bsld,de->bsle", tmpl, params["proj_W"]) \
         + params["proj_b"].reshape(D)
    eb = eb.sum(axis=-2)                                             # (B,S,D)
    y = tok + params["bias_scale"].reshape(()) * eb
    mean = y.mean(-1, keepdims=True)
    var = jnp.mean((y - mean) ** 2, -1, keepdims=True)
    yn = (y - mean) * lax.rsqrt(var + LN_EPS)
    return yn * params["ln_gamma"].reshape(D) + params["ln_beta"].reshape(D)


if __name__ == "__main__":
    # Small config implied by the module: embed_dim=32, model vocab=64, tokenizer vocab=48
    B, S, L, D = 2, 8, 4, 32
    VOCAB, TOK_VOCAB = 64, 48

    key = jax.random.PRNGKey(0)
    k_params, k_x, k_seq = jax.random.split(key, 3)

    params = make_params(k_params, vocab_size=VOCAB, tok_vocab_size=TOK_VOCAB, embed_dim=D)
    x_ids = jax.random.randint(k_x, (B, S), 0, VOCAB, dtype=jnp.int32)
    seq_ids = jax.random.randint(k_seq, (B, S, L), 0, TOK_VOCAB, dtype=jnp.int32)

    out = embeddings_forward(x_ids, seq_ids, params)
    jax.block_until_ready(out)
    assert out.shape == (B, S, D) and out.dtype == jnp.float32

    ref = reference_forward(x_ids, seq_ids, params)
    max_err = float(jnp.max(jnp.abs(out - ref)))
    assert max_err < 5e-2, f"max abs error too large: {max_err}"
    print("KERNEL_OK")
</pallas_src>

<mosaic_0001>
module attributes {stable_mosaic.version = 11 : i64} {
  func.func @embeddings_kernel(%arg0: i32, %arg1: memref<8x4xi32, #tpu.memory_space<vmem>>, %arg2: memref<8x16xi32, #tpu.memory_space<vmem>>, %arg3: memref<4x64x128xf32, #tpu.memory_space<vmem>>, %arg4: memref<4x48x128xf32, #tpu.memory_space<vmem>>, %arg5: memref<128x128xf32, #tpu.memory_space<vmem>>, %arg6: memref<1x128xf32, #tpu.memory_space<vmem>>, %arg7: memref<1x128xf32, #tpu.memory_space<vmem>>, %arg8: memref<1x128xf32, #tpu.memory_space<vmem>>, %arg9: memref<8x128xf32, #tpu.memory_space<vmem>>) attributes {dimension_semantics = [#tpu.dimension_semantics<parallel>], iteration_bounds = array<i64: 2>, scalar_prefetch = 0 : i64, scratch_operands = 0 : i64, tpu.core_type = #tpu.core_type<tc>, window_params = [{transform_indices = @transform_0, window_bounds = array<i64: 8, 4>}, {transform_indices = @transform_1, window_bounds = array<i64: 8, 16>}, {pipeline_mode = #tpu.pipeline_mode<synchronous>, transform_indices = @transform_2, window_bounds = array<i64: 4, 64, 128>}, {pipeline_mode = #tpu.pipeline_mode<synchronous>, transform_indices = @transform_3, window_bounds = array<i64: 4, 48, 128>}, {pipeline_mode = #tpu.pipeline_mode<synchronous>, transform_indices = @transform_4, window_bounds = array<i64: 128, 128>}, {pipeline_mode = #tpu.pipeline_mode<synchronous>, transform_indices = @transform_5, window_bounds = array<i64: 1, 128>}, {pipeline_mode = #tpu.pipeline_mode<synchronous>, transform_indices = @transform_6, window_bounds = array<i64: 1, 128>}, {pipeline_mode = #tpu.pipeline_mode<synchronous>, transform_indices = @transform_7, window_bounds = array<i64: 1, 128>}, {transform_indices = @transform_8, window_bounds = array<i64: 8, 128>}]} {
    %c0 = arith.constant 0 : index
    %c0_0 = arith.constant 0 : index
    %0 = vector.load %arg1[%c0, %c0_0] : memref<8x4xi32, #tpu.memory_space<vmem>>, vector<8x4xi32>
    %c0_1 = arith.constant 0 : index
    %c0_2 = arith.constant 0 : index
    %1 = vector.load %arg2[%c0_1, %c0_2] : memref<8x16xi32, #tpu.memory_space<vmem>>, vector<8x16xi32>
    %2 = tpu.iota {dimensions = array<i32: 1>} : vector<8x64xi32>
    %3 = tpu.iota {dimensions = array<i32: 1>} : vector<8x48xi32>
    %cst = arith.constant 0.000000e+00 : f32
    %4 = vector.broadcast %cst : f32 to vector<8x128xf32>
    %5 = vector.extract_strided_slice %0 {offsets = [0, 0], sizes = [8, 1], strides = [1, 1]} : vector<8x4xi32> to vector<8x1xi32>
    %6 = vector.broadcast %5 : vector<8x1xi32> to vector<8x64xi32>
    %7 = arith.cmpi eq, %6, %2 : vector<8x64xi32>
    %8 = arith.extui %7 : vector<8x64xi1> to vector<8x64xi32>
    %9 = arith.sitofp %8 : vector<8x64xi32> to vector<8x64xf32>
    %c0_3 = arith.constant 0 : index
    %c0_4 = arith.constant 0 : index
    %c0_5 = arith.constant 0 : index
    %10 = vector.load %arg3[%c0_3, %c0_4, %c0_5] : memref<4x64x128xf32, #tpu.memory_space<vmem>>, vector<1x64x128xf32>
    %11 = vector.shape_cast %10 : vector<1x64x128xf32> to vector<64x128xf32>
    %cst_6 = arith.constant dense<0.000000e+00> : vector<8x128xf32>
    %12 = tpu.matmul %9, %11, %cst_6 {dimension_numbers = #tpu.dot_dimension_numbers<[1], [0], [0], [1], [0, 0, 1, 1], [], []>} : vector<8x64xf32>, vector<64x128xf32>, vector<8x128xf32> -> vector<8x128xf32>
    %13 = arith.addf %4, %12 : vector<8x128xf32>
    %cst_7 = arith.constant 0.000000e+00 : f32
    %14 = vector.broadcast %cst_7 : f32 to vector<8x48xf32>
    %15 = vector.extract_strided_slice %1 {offsets = [0, 0], sizes = [8, 1], strides = [1, 1]} : vector<8x16xi32> to vector<8x1xi32>
    %16 = vector.broadcast %15 : vector<8x1xi32> to vector<8x48xi32>
    %17 = arith.cmpi eq, %16, %3 : vector<8x48xi32>
    %18 = arith.extui %17 : vector<8x48xi1> to vector<8x48xi32>
    %19 = arith.sitofp %18 : vector<8x48xi32> to vector<8x48xf32>
    %20 = arith.addf %14, %19 : vector<8x48xf32>
    %21 = vector.extract_strided_slice %1 {offsets = [0, 1], sizes = [8, 1], strides = [1, 1]} : vector<8x16xi32> to vector<8x1xi32>
    %22 = vector.broadcast %21 : vector<8x1xi32> to vector<8x48xi32>
    %23 = arith.cmpi eq, %22, %3 : vector<8x48xi32>
    %24 = arith.extui %23 : vector<8x48xi1> to vector<8x48xi32>
    %25 = arith.sitofp %24 : vector<8x48xi32> to vector<8x48xf32>
    %26 = arith.addf %20, %25 : vector<8x48xf32>
    %27 = vector.extract_strided_slice %1 {offsets = [0, 2], sizes = [8, 1], strides = [1, 1]} : vector<8x16xi32> to vector<8x1xi32>
    %28 = vector.broadcast %27 : vector<8x1xi32> to vector<8x48xi32>
    %29 = arith.cmpi eq, %28, %3 : vector<8x48xi32>
    %30 = arith.extui %29 : vector<8x48xi1> to vector<8x48xi32>
    %31 = arith.sitofp %30 : vector<8x48xi32> to vector<8x48xf32>
    %32 = arith.addf %26, %31 : vector<8x48xf32>
    %33 = vector.extract_strided_slice %1 {offsets = [0, 3], sizes = [8, 1], strides = [1, 1]} : vector<8x16xi32> to vector<8x1xi32>
    %34 = vector.broadcast %33 : vector<8x1xi32> to vector<8x48xi32>
    %35 = arith.cmpi eq, %34, %3 : vector<8x48xi32>
    %36 = arith.extui %35 : vector<8x48xi1> to vector<8x48xi32>
    %37 = arith.sitofp %36 : vector<8x48xi32> to vector<8x48xf32>
    %38 = arith.addf %32, %37 : vector<8x48xf32>
    %c0_8 = arith.constant 0 : index
    %c0_9 = arith.constant 0 : index
    %c0_10 = arith.constant 0 : index
    %39 = vector.load %arg4[%c0_8, %c0_9, %c0_10] : memref<4x48x128xf32, #tpu.memory_space<vmem>>, vector<1x48x128xf32>
    %40 = vector.shape_cast %39 : vector<1x48x128xf32> to vector<48x128xf32>
    %cst_11 = arith.constant dense<0.000000e+00> : vector<8x128xf32>
    %41 = tpu.matmul %38, %40, %cst_11 {dimension_numbers = #tpu.dot_dimension_numbers<[1], [0], [0], [1], [0, 0, 1, 1], [], []>} : vector<8x48xf32>, vector<48x128xf32>, vector<8x128xf32> -> vector<8x128xf32>
    %42 = arith.addf %13, %41 : vector<8x128xf32>
    %43 = vector.extract_strided_slice %0 {offsets = [0, 1], sizes = [8, 1], strides = [1, 1]} : vector<8x4xi32> to vector<8x1xi32>
    %44 = vector.broadcast %43 : vector<8x1xi32> to vector<8x64xi32>
    %45 = arith.cmpi eq, %44, %2 : vector<8x64xi32>
    %46 = arith.extui %45 : vector<8x64xi1> to vector<8x64xi32>
    %47 = arith.sitofp %46 : vector<8x64xi32> to vector<8x64xf32>
    %c1 = arith.constant 1 : index
    %c0_12 = arith.constant 0 : index
    %c0_13 = arith.constant 0 : index
    %48 = vector.load %arg3[%c1, %c0_12, %c0_13] : memref<4x64x128xf32, #tpu.memory_space<vmem>>, vector<1x64x128xf32>
    %49 = vector.shape_cast %48 : vector<1x64x128xf32> to vector<64x128xf32>
    %cst_14 = arith.constant dense<0.000000e+00> : vector<8x128xf32>
    %50 = tpu.matmul %47, %49, %cst_14 {dimension_numbers = #tpu.dot_dimension_numbers<[1], [0], [0], [1], [0, 0, 1, 1], [], []>} : vector<8x64xf32>, vector<64x128xf32>, vector<8x128xf32> -> vector<8x128xf32>
    %51 = arith.addf %42, %50 : vector<8x128xf32>
    %cst_15 = arith.constant 0.000000e+00 : f32
    %52 = vector.broadcast %cst_15 : f32 to vector<8x48xf32>
    %53 = vector.extract_strided_slice %1 {offsets = [0, 4], sizes = [8, 1], strides = [1, 1]} : vector<8x16xi32> to vector<8x1xi32>
    %54 = vector.broadcast %53 : vector<8x1xi32> to vector<8x48xi32>
    %55 = arith.cmpi eq, %54, %3 : vector<8x48xi32>
    %56 = arith.extui %55 : vector<8x48xi1> to vector<8x48xi32>
    %57 = arith.sitofp %56 : vector<8x48xi32> to vector<8x48xf32>
    %58 = arith.addf %52, %57 : vector<8x48xf32>
    %59 = vector.extract_strided_slice %1 {offsets = [0, 5], sizes = [8, 1], strides = [1, 1]} : vector<8x16xi32> to vector<8x1xi32>
    %60 = vector.broadcast %59 : vector<8x1xi32> to vector<8x48xi32>
    %61 = arith.cmpi eq, %60, %3 : vector<8x48xi32>
    %62 = arith.extui %61 : vector<8x48xi1> to vector<8x48xi32>
    %63 = arith.sitofp %62 : vector<8x48xi32> to vector<8x48xf32>
    %64 = arith.addf %58, %63 : vector<8x48xf32>
    %65 = vector.extract_strided_slice %1 {offsets = [0, 6], sizes = [8, 1], strides = [1, 1]} : vector<8x16xi32> to vector<8x1xi32>
    %66 = vector.broadcast %65 : vector<8x1xi32> to vector<8x48xi32>
    %67 = arith.cmpi eq, %66, %3 : vector<8x48xi32>
    %68 = arith.extui %67 : vector<8x48xi1> to vector<8x48xi32>
    %69 = arith.sitofp %68 : vector<8x48xi32> to vector<8x48xf32>
    %70 = arith.addf %64, %69 : vector<8x48xf32>
    %71 = vector.extract_strided_slice %1 {offsets = [0, 7], sizes = [8, 1], strides = [1, 1]} : vector<8x16xi32> to vector<8x1xi32>
    %72 = vector.broadcast %71 : vector<8x1xi32> to vector<8x48xi32>
    %73 = arith.cmpi eq, %72, %3 : vector<8x48xi32>
    %74 = arith.extui %73 : vector<8x48xi1> to vector<8x48xi32>
    %75 = arith.sitofp %74 : vector<8x48xi32> to vector<8x48xf32>
    %76 = arith.addf %70, %75 : vector<8x48xf32>
    %c1_16 = arith.constant 1 : index
    %c0_17 = arith.constant 0 : index
    %c0_18 = arith.constant 0 : index
    %77 = vector.load %arg4[%c1_16, %c0_17, %c0_18] : memref<4x48x128xf32, #tpu.memory_space<vmem>>, vector<1x48x128xf32>
    %78 = vector.shape_cast %77 : vector<1x48x128xf32> to vector<48x128xf32>
    %cst_19 = arith.constant dense<0.000000e+00> : vector<8x128xf32>
    %79 = tpu.matmul %76, %78, %cst_19 {dimension_numbers = #tpu.dot_dimension_numbers<[1], [0], [0], [1], [0, 0, 1, 1], [], []>} : vector<8x48xf32>, vector<48x128xf32>, vector<8x128xf32> -> vector<8x128xf32>
    %80 = arith.addf %51, %79 : vector<8x128xf32>
    %81 = vector.extract_strided_slice %0 {offsets = [0, 2], sizes = [8, 1], strides = [1, 1]} : vector<8x4xi32> to vector<8x1xi32>
    %82 = vector.broadcast %81 : vector<8x1xi32> to vector<8x64xi32>
    %83 = arith.cmpi eq, %82, %2 : vector<8x64xi32>
    %84 = arith.extui %83 : vector<8x64xi1> to vector<8x64xi32>
    %85 = arith.sitofp %84 : vector<8x64xi32> to vector<8x64xf32>
    %c2 = arith.constant 2 : index
    %c0_20 = arith.constant 0 : index
    %c0_21 = arith.constant 0 : index
    %86 = vector.load %arg3[%c2, %c0_20, %c0_21] : memref<4x64x128xf32, #tpu.memory_space<vmem>>, vector<1x64x128xf32>
    %87 = vector.shape_cast %86 : vector<1x64x128xf32> to vector<64x128xf32>
    %cst_22 = arith.constant dense<0.000000e+00> : vector<8x128xf32>
    %88 = tpu.matmul %85, %87, %cst_22 {dimension_numbers = #tpu.dot_dimension_numbers<[1], [0], [0], [1], [0, 0, 1, 1], [], []>} : vector<8x64xf32>, vector<64x128xf32>, vector<8x128xf32> -> vector<8x128xf32>
    %89 = arith.addf %80, %88 : vector<8x128xf32>
    %cst_23 = arith.constant 0.000000e+00 : f32
    %90 = vector.broadcast %cst_23 : f32 to vector<8x48xf32>
    %91 = vector.extract_strided_slice %1 {offsets = [0, 8], sizes = [8, 1], strides = [1, 1]} : vector<8x16xi32> to vector<8x1xi32>
    %92 = vector.broadcast %91 : vector<8x1xi32> to vector<8x48xi32>
    %93 = arith.cmpi eq, %92, %3 : vector<8x48xi32>
    %94 = arith.extui %93 : vector<8x48xi1> to vector<8x48xi32>
    %95 = arith.sitofp %94 : vector<8x48xi32> to vector<8x48xf32>
    %96 = arith.addf %90, %95 : vector<8x48xf32>
    %97 = vector.extract_strided_slice %1 {offsets = [0, 9], sizes = [8, 1], strides = [1, 1]} : vector<8x16xi32> to vector<8x1xi32>
    %98 = vector.broadcast %97 : vector<8x1xi32> to vector<8x48xi32>
    %99 = arith.cmpi eq, %98, %3 : vector<8x48xi32>
    %100 = arith.extui %99 : vector<8x48xi1> to vector<8x48xi32>
    %101 = arith.sitofp %100 : vector<8x48xi32> to vector<8x48xf32>
    %102 = arith.addf %96, %101 : vector<8x48xf32>
    %103 = vector.extract_strided_slice %1 {offsets = [0, 10], sizes = [8, 1], strides = [1, 1]} : vector<8x16xi32> to vector<8x1xi32>
    %104 = vector.broadcast %103 : vector<8x1xi32> to vector<8x48xi32>
    %105 = arith.cmpi eq, %104, %3 : vector<8x48xi32>
    %106 = arith.extui %105 : vector<8x48xi1> to vector<8x48xi32>
    %107 = arith.sitofp %106 : vector<8x48xi32> to vector<8x48xf32>
    %108 = arith.addf %102, %107 : vector<8x48xf32>
    %109 = vector.extract_strided_slice %1 {offsets = [0, 11], sizes = [8, 1], strides = [1, 1]} : vector<8x16xi32> to vector<8x1xi32>
    %110 = vector.broadcast %109 : vector<8x1xi32> to vector<8x48xi32>
    %111 = arith.cmpi eq, %110, %3 : vector<8x48xi32>
    %112 = arith.extui %111 : vector<8x48xi1> to vector<8x48xi32>
    %113 = arith.sitofp %112 : vector<8x48xi32> to vector<8x48xf32>
    %114 = arith.addf %108, %113 : vector<8x48xf32>
    %c2_24 = arith.constant 2 : index
    %c0_25 = arith.constant 0 : index
    %c0_26 = arith.constant 0 : index
    %115 = vector.load %arg4[%c2_24, %c0_25, %c0_26] : memref<4x48x128xf32, #tpu.memory_space<vmem>>, vector<1x48x128xf32>
    %116 = vector.shape_cast %115 : vector<1x48x128xf32> to vector<48x128xf32>
    %cst_27 = arith.constant dense<0.000000e+00> : vector<8x128xf32>
    %117 = tpu.matmul %114, %116, %cst_27 {dimension_numbers = #tpu.dot_dimension_numbers<[1], [0], [0], [1], [0, 0, 1, 1], [], []>} : vector<8x48xf32>, vector<48x128xf32>, vector<8x128xf32> -> vector<8x128xf32>
    %118 = arith.addf %89, %117 : vector<8x128xf32>
    %119 = vector.extract_strided_slice %0 {offsets = [0, 3], sizes = [8, 1], strides = [1, 1]} : vector<8x4xi32> to vector<8x1xi32>
    %120 = vector.broadcast %119 : vector<8x1xi32> to vector<8x64xi32>
    %121 = arith.cmpi eq, %120, %2 : vector<8x64xi32>
    %122 = arith.extui %121 : vector<8x64xi1> to vector<8x64xi32>
    %123 = arith.sitofp %122 : vector<8x64xi32> to vector<8x64xf32>
    %c3 = arith.constant 3 : index
    %c0_28 = arith.constant 0 : index
    %c0_29 = arith.constant 0 : index
    %124 = vector.load %arg3[%c3, %c0_28, %c0_29] : memref<4x64x128xf32, #tpu.memory_space<vmem>>, vector<1x64x128xf32>
    %125 = vector.shape_cast %124 : vector<1x64x128xf32> to vector<64x128xf32>
    %cst_30 = arith.constant dense<0.000000e+00> : vector<8x128xf32>
    %126 = tpu.matmul %123, %125, %cst_30 {dimension_numbers = #tpu.dot_dimension_numbers<[1], [0], [0], [1], [0, 0, 1, 1], [], []>} : vector<8x64xf32>, vector<64x128xf32>, vector<8x128xf32> -> vector<8x128xf32>
    %127 = arith.addf %118, %126 : vector<8x128xf32>
    %cst_31 = arith.constant 0.000000e+00 : f32
    %128 = vector.broadcast %cst_31 : f32 to vector<8x48xf32>
    %129 = vector.extract_strided_slice %1 {offsets = [0, 12], sizes = [8, 1], strides = [1, 1]} : vector<8x16xi32> to vector<8x1xi32>
    %130 = vector.broadcast %129 : vector<8x1xi32> to vector<8x48xi32>
    %131 = arith.cmpi eq, %130, %3 : vector<8x48xi32>
    %132 = arith.extui %131 : vector<8x48xi1> to vector<8x48xi32>
    %133 = arith.sitofp %132 : vector<8x48xi32> to vector<8x48xf32>
    %134 = arith.addf %128, %133 : vector<8x48xf32>
    %135 = vector.extract_strided_slice %1 {offsets = [0, 13], sizes = [8, 1], strides = [1, 1]} : vector<8x16xi32> to vector<8x1xi32>
    %136 = vector.broadcast %135 : vector<8x1xi32> to vector<8x48xi32>
    %137 = arith.cmpi eq, %136, %3 : vector<8x48xi32>
    %138 = arith.extui %137 : vector<8x48xi1> to vector<8x48xi32>
    %139 = arith.sitofp %138 : vector<8x48xi32> to vector<8x48xf32>
    %140 = arith.addf %134, %139 : vector<8x48xf32>
    %141 = vector.extract_strided_slice %1 {offsets = [0, 14], sizes = [8, 1], strides = [1, 1]} : vector<8x16xi32> to vector<8x1xi32>
    %142 = vector.broadcast %141 : vector<8x1xi32> to vector<8x48xi32>
    %143 = arith.cmpi eq, %142, %3 : vector<8x48xi32>
    %144 = arith.extui %143 : vector<8x48xi1> to vector<8x48xi32>
    %145 = arith.sitofp %144 : vector<8x48xi32> to vector<8x48xf32>
    %146 = arith.addf %140, %145 : vector<8x48xf32>
    %147 = vector.extract_strided_slice %1 {offsets = [0, 15], sizes = [8, 1], strides = [1, 1]} : vector<8x16xi32> to vector<8x1xi32>
    %148 = vector.broadcast %147 : vector<8x1xi32> to vector<8x48xi32>
    %149 = arith.cmpi eq, %148, %3 : vector<8x48xi32>
    %150 = arith.extui %149 : vector<8x48xi1> to vector<8x48xi32>
    %151 = arith.sitofp %150 : vector<8x48xi32> to vector<8x48xf32>
    %152 = arith.addf %146, %151 : vector<8x48xf32>
    %c3_32 = arith.constant 3 : index
    %c0_33 = arith.constant 0 : index
    %c0_34 = arith.constant 0 : index
    %153 = vector.load %arg4[%c3_32, %c0_33, %c0_34] : memref<4x48x128xf32, #tpu.memory_space<vmem>>, vector<1x48x128xf32>
    %154 = vector.shape_cast %153 : vector<1x48x128xf32> to vector<48x128xf32>
    %cst_35 = arith.constant dense<0.000000e+00> : vector<8x128xf32>
    %155 = tpu.matmul %152, %154, %cst_35 {dimension_numbers = #tpu.dot_dimension_numbers<[1], [0], [0], [1], [0, 0, 1, 1], [], []>} : vector<8x48xf32>, vector<48x128xf32>, vector<8x128xf32> -> vector<8x128xf32>
    %156 = arith.addf %127, %155 : vector<8x128xf32>
    %c0_36 = arith.constant 0 : index
    %c0_37 = arith.constant 0 : index
    %157 = vector.load %arg6[%c0_36, %c0_37] : memref<1x128xf32, #tpu.memory_space<vmem>>, vector<1x128xf32>
    %158 = vector.broadcast %157 : vector<1x128xf32> to vector<8x128xf32>
    %159 = arith.addf %156, %158 : vector<8x128xf32>
    %c0_38 = arith.constant 0 : index
    %c0_39 = arith.constant 0 : index
    %160 = vector.load %arg5[%c0_38, %c0_39] : memref<128x128xf32, #tpu.memory_space<vmem>>, vector<128x128xf32>
    %cst_40 = arith.constant dense<0.000000e+00> : vector<8x128xf32>
    %161 = tpu.matmul %159, %160, %cst_40 {dimension_numbers = #tpu.dot_dimension_numbers<[1], [0], [0], [1], [0, 0, 1, 1], [], []>} : vector<8x128xf32>, vector<128x128xf32>, vector<8x128xf32> -> vector<8x128xf32>
    %162 = arith.subf %159, %161 : vector<8x128xf32>
    %163 = arith.mulf %162, %162 : vector<8x128xf32>
    %cst_41 = arith.constant dense<0.000000e+00> : vector<8x128xf32>
    %164 = tpu.matmul %163, %160, %cst_41 {dimension_numbers = #tpu.dot_dimension_numbers<[1], [0], [0], [1], [0, 0, 1, 1], [], []>} : vector<8x128xf32>, vector<128x128xf32>, vector<8x128xf32> -> vector<8x128xf32>
    %cst_42 = arith.constant 9.99999974E-6 : f32
    %165 = vector.broadcast %cst_42 : f32 to vector<8x128xf32>
    %166 = arith.addf %164, %165 : vector<8x128xf32>
    %167 = math.rsqrt %166 : vector<8x128xf32>
    %168 = arith.mulf %162, %167 : vector<8x128xf32>
    %c0_43 = arith.constant 0 : index
    %c0_44 = arith.constant 0 : index
    %169 = vector.load %arg7[%c0_43, %c0_44] : memref<1x128xf32, #tpu.memory_space<vmem>>, vector<1x128xf32>
    %170 = vector.broadcast %169 : vector<1x128xf32> to vector<8x128xf32>
    %171 = arith.mulf %168, %170 : vector<8x128xf32>
    %c0_45 = arith.constant 0 : index
    %c0_46 = arith.constant 0 : index
    %172 = vector.load %arg8[%c0_45, %c0_46] : memref<1x128xf32, #tpu.memory_space<vmem>>, vector<1x128xf32>
    %173 = vector.broadcast %172 : vector<1x128xf32> to vector<8x128xf32>
    %174 = arith.addf %171, %173 : vector<8x128xf32>
    %c0_47 = arith.constant 0 : index
    %c0_48 = arith.constant 0 : index
    %175 = vector.load %arg9[%c0_47, %c0_48] : memref<8x128xf32, #tpu.memory_space<vmem>>, vector<8x128xf32>
    tpu.vector_store %arg9[%c0_47, %c0_48], %174 {strides = array<i32>} : memref<8x128xf32, #tpu.memory_space<vmem>>, vector<8x128xf32>,
    return
  }
  func.func @transform_0(%arg0: i32) -> (i32, i32) {
    %c0_i32 = arith.constant 0 : i32
    %c0_i32_0 = arith.constant 0 : i32
    return %arg0, %c0_i32 : i32, i32
  }
  func.func @transform_1(%arg0: i32) -> (i32, i32) {
    %c0_i32 = arith.constant 0 : i32
    %c0_i32_0 = arith.constant 0 : i32
    return %arg0, %c0_i32 : i32, i32
  }
  func.func @transform_2(%arg0: i32) -> (i32, i32, i32) {
    %c0_i32 = arith.constant 0 : i32
    %c0_i32_0 = arith.constant 0 : i32
    %c0_i32_1 = arith.constant 0 : i32
    %c0_i32_2 = arith.constant 0 : i32
    return %c0_i32, %c0_i32_0, %c0_i32_1 : i32, i32, i32
  }
  func.func @transform_3(%arg0: i32) -> (i32, i32, i32) {
    %c0_i32 = arith.constant 0 : i32
    %c0_i32_0 = arith.constant 0 : i32
    %c0_i32_1 = arith.constant 0 : i32
    %c0_i32_2 = arith.constant 0 : i32
    return %c0_i32, %c0_i32_0, %c0_i32_1 : i32, i32, i32
  }
  func.func @transform_4(%arg0: i32) -> (i32, i32) {
    %c0_i32 = arith.constant 0 : i32
    %c0_i32_0 = arith.constant 0 : i32
    %c0_i32_1 = arith.constant 0 : i32
    return %c0_i32, %c0_i32_0 : i32, i32
  }
  func.func @transform_5(%arg0: i32) -> (i32, i32) {
    %c0_i32 = arith.constant 0 : i32
    %c0_i32_0 = arith.constant 0 : i32
    %c0_i32_1 = arith.constant 0 : i32
    return %c0_i32, %c0_i32_0 : i32, i32
  }
  func.func @transform_6(%arg0: i32) -> (i32, i32) {
    %c0_i32 = arith.constant 0 : i32
    %c0_i32_0 = arith.constant 0 : i32
    %c0_i32_1 = arith.constant 0 : i32
    return %c0_i32, %c0_i32_0 : i32, i32
  }
  func.func @transform_7(%arg0: i32) -> (i32, i32) {
    %c0_i32 = arith.constant 0 : i32
    %c0_i32_0 = arith.constant 0 : i32
    %c0_i32_1 = arith.constant 0 : i32
    return %c0_i32, %c0_i32_0 : i32, i32
  }
  func.func @transform_8(%arg0: i32) -> (i32, i32) {
    %c0_i32 = arith.constant 0 : i32
    %c0_i32_0 = arith.constant 0 : i32
    return %arg0, %c0_i32 : i32, i32
  }
}

</mosaic_0001>

<bundles_post_ra>
// kernel: tpu_custom_call.1
= control target key start
LH: loop header
LB: loop body
LE: loop exit
PB: predicated region body
PF: predicated region fallthrough
CT: control target
= control target key end

     0   :  { %s2473_s0 = inlined_call_operand.vmem [shape: s32[16,4], index: 0, kind: input, shape index: {}]   ;;  %s2474_s1 = inlined_call_operand.vmem [shape: s32[16,16], index: 1, kind: input, shape index: {}]   ;;  %s2475_s2 = inlined_call_operand.hbm [shape: f32[4,64,128], index: 2, kind: input, shape index: {}]   ;;  %s2476_s3 = inlined_call_operand.hbm [shape: f32[4,48,128], index: 3, kind: input, shape index: {}]   ;;  %s2477_s4 = inlined_call_operand.hbm [shape: f32[128,128], index: 4, kind: input, shape index: {}]   ;;  %s2478_s5 = inlined_call_operand.vmem [shape: f32[1,128], index: 5, kind: input, shape index: {}]   ;;  %s2479_s6 = inlined_call_operand.vmem [shape: f32[1,128], index: 6, kind: input, shape index: {}]   ;;  %s2480_s7 = inlined_call_operand.vmem [shape: f32[1,128], index: 7, kind: input, shape index: {}]   ;;  %s2481_s8 = inlined_call_operand.hbm [shape: f32[16,128], index: 8, kind: output, shape index: {}]  }
   0x1   :  { %2484 = sst [smem:[#allocation12_spill]] %s2473_s0 }
   0x2   :  { %13 = vsyncpa [#allocation3], 0 }
   0x3   :  { %14 = vsyncpa [#allocation6], 0 }
   0x4   :  { %15 = vsyncpa [#allocation4], 0 }
   0x5   :  { %17 = vsyncpa [#allocation4 + $0x1], 0  ;;  %s2139_s27 = smov 0   ;;  %s2141_s28 = smov 0  }
   0x6   :  { %s2143_s29 = smov 0   ;;  %s2145_s30 = smov 0  }
   0x7 LB: > { %s2160_s9 = sadd.s32 4294967295, %s2068_s30   ;;  %s1457_s10 = sadd.s32 4294967294, %s2068_s30   ;;  %s2068_s30 = sphi %s2145_s30, %s2499_s30   ;;  %s2064_s29 = sphi %s2143_s29, %s2498_s29   ;;  %s2060_s28 = sphi %s2141_s28, %s2497_s28   ;;  %s2056_s27 = sphi %s2139_s27, %s2496_s27  }
   0x8   : > { %s2164_s11 = sadd.s32 1, %s2068_s30   ;;  %s208_s12 = sadd.s32 1, %s2064_s29 }
   0x9   : > { %s205_s13 = ssub.s32 %s2068_s30, %s2164_s11  ;;  %p218_p0 = scmp.ne.s32.totalorder %s2064_s29, %s2060_s28 }
   0xa   : > { %p206_p1 = scmp.eq.s32.totalorder %s205_s13, 0  ;;  %p219_p2 = scmp.eq.s32.totalorder %s2160_s9, 1 }
   0xb   : > { %p224_p3 = scmp.ne.s32.totalorder %s2060_s28, %s2056_s27  ;;  %p225_p4 = scmp.eq.s32.totalorder %s1457_s10, 1 }
   0xc   : > { %s2175_s14 = scalar_select %p206_p1, %s2064_s29, %s208_s12  }
   0xd   : > { %p2177_p5 = por %p219_p2, %p218_p0  ;;  %p2181_p6 = por %p225_p4, %p224_p3 }
   0xe   : > { %p1458_p7 = scmp.ge.s32.totalorder %s2068_s30, 1  ;;  %p232_p8 = scmp.lt.s32.totalorder %s2068_s30, 3 }
   0xf   : > { %s2485_s15 = scalar_select %p2177_p5, 1, 0 }
  0x10   : > { %s2486_s16 = scalar_select %p2181_p6, 1, 0 }
  0x11   : > { %p2482_p9 = scmp.eq.s32.totalorder %s2160_s9, 0  ;;  %p2188_p10 = pnand %p1458_p7, %p232_p8 }
  0x12   : > { %s2070_s18 = smov [#allocation5]   ;;  %s2071_s21 = smov [#allocation2]  }
  0x13   : > { %p1823_p11 = pneg %p2188_p10  ;;  %s257_s19 = sshll.u32 %s2070_s18, 4  ;;  %s258_s19 = int_to_ptr.vmem [resolvable:$true] %s257_s19 }
  0x14   : > { %s244_s22 = sshll.u32 %s2071_s21, 4  ;;  %s2072_s23 = smov [#allocation7]   ;;  %s245_s22 = int_to_ptr.vmem [resolvable:$true] %s244_s22 }
  0x15   : > { %p2196_p12 = pnand %p2482_p9, %p1823_p11  ;;  %s270_s24 = sshll.u32 %s2072_s23, 4  ;;  %s271_s24 = int_to_ptr.vmem [resolvable:$true] %s270_s24 }
  0x16   : > { %s1933_s25 = scalar_lea.vmem %s258_s19, 3072  ;;  %p1941_p3 = scmp.lt.s32.totalorder %s258_s19, %s258_s19 }
  0x17   : > { %p1924_p13 = pneg %p2196_p12  ;;  %p1934_p0 = scmp.ne.s32.totalorder %s258_s19, %s1933_s25 }
  0x18   : > { %p1942_p4 = scmp.lt.s32.totalorder %s1933_s25, %s1933_s25 }
  0x19   : > { %p1936_p1 = pnand %p1934_p0, %p1924_p13 }
  0x1a   : > { %p1943_p7 = por %p1942_p4, %p1941_p3 }
  0x1b   : > { %p1937_p2 = pneg %p1936_p1 }
  0x1d   : > { %p1944_p8 = pnand %p1943_p7, %p1937_p2 }
  0x1f   : > { %1947 = shalt.err (!%p1944_p8)
}
  0x20   : > { %s2073_s26 = smov 128   ;;  %s2074_s10 = smov 8  }
  0x21   : > { %1829 = dma.hbm_to_vmem [thread:$0]  (!%p2196_p12), %s2476_s3, 3072, %s258_s19, [#allocation6], %s2073_s26, %s2073_s26, %s2074_s10  }
  0x22   : > { %s1959_s18 = scalar_lea.vmem %s245_s22, 4096  ;;  %p1967_p9 = scmp.lt.s32.totalorder %s245_s22, %s245_s22 }
  0x23   : > { %p1960_p11 = scmp.ne.s32.totalorder %s245_s22, %s1959_s18  ;;  %p1968_p6 = scmp.lt.s32.totalorder %s1959_s18, %s1959_s18 }
  0x25   : > { %p1962_p0 = pnand %p1960_p11, %p1924_p13  ;;  %p1969_p3 = por %p1968_p6, %p1967_p9 }
  0x27   : > { %p1963_p1 = pneg %p1962_p0 }
  0x29   : > { %p1970_p2 = pnand %p1969_p3, %p1963_p1 }
  0x2b   : > { %1973 = shalt.err (!%p1970_p2)
}
  0x2c   : > { %1826 = dma.hbm_to_vmem [thread:$0]  (!%p2196_p12), %s2475_s2, 4096, %s245_s22, [#allocation3], %s2073_s26, %s2073_s26, %s2074_s10  }
  0x2d   : > { %s1985_s19 = scalar_lea.vmem %s271_s24, 2048  ;;  %p1993_p11 = scmp.lt.s32.totalorder %s271_s24, %s271_s24 }
  0x2e   : > { %p1986_p4 = scmp.ne.s32.totalorder %s271_s24, %s1985_s19  ;;  %p1994_p0 = scmp.lt.s32.totalorder %s1985_s19, %s1985_s19 }
  0x30   : > { %p1988_p7 = pnand %p1986_p4, %p1924_p13  ;;  %p1995_p5 = por %p1994_p0, %p1993_p11 }
  0x32   : > { %p1989_p8 = pneg %p1988_p7 }
  0x34   : > { %p1996_p6 = pnand %p1995_p5, %p1989_p8 }
  0x36   : > { %1999 = shalt.err (!%p1996_p6)
}
  0x37   : > { %1832 = dma.hbm_to_vmem [thread:$0]  (!%p2196_p12), %s2477_s4, 2048, %s271_s24, [#allocation6], %s2073_s26, %s2073_s26, %s2074_s10  }
  0x38   : > { %309 = sbr.rel (%p2188_p10) target bundleno = 882 (0x372), region = 52  ;;  %p2489_p9 = scmp.eq.s32.totalorder (!%p2188_p10), %s2160_s9, 0 }
  0x3d   : > { %2043 = dma.done.wait (%p2489_p9), [#allocation3], 4096   ;;  %p2490_p13 = pmov %p2489_p9 }
  0x3e   : > { %p2491_p1 = pmov %p2489_p9 }
  0x3f   : > { %2045 = vsyncadd (%p2490_p13), [#allocation3], 4294963200 }
  0x40   : > { %2047 = dma.done.wait (%p2491_p1), [#allocation6], 5120   ;;  %p2492_p5 = pmov %p2491_p1 }
  0x41   : > { %p354_p3 = scmp.lt.s32.totalorder %s2160_s9, 1  ;;  %v2075_v0 = vmov 2   ;;  %v2076_v1 = vmov 0   ;;  %v2077_v2 = vmov 0.0   ;;  %v379_v4 = vld [vmem:[#allocation2 + $0x38] sm:$0xff]  ;;  %v378_v5 = vld [vmem:[#allocation2 + $0x30] sm:$0xff]  ;;  %v364_v33 = vlaneseq }
  0x42   : > { %2049 = vsyncadd (%p2492_p5), [#allocation6], 4294962176  ;;  %1901 = vset.pattern.permute.xlu1 %v2075_v0  ;;  %1899 = vset.pattern.permute.xlu0 %v2076_v1  ;;  %v413_v6 = vld [vmem:[#allocation5 + $0x28] sm:$0xff]  ;;  %v412_v7 = vld [vmem:[#allocation5 + $0x20] sm:$0xff]  ;;  %v2078_v8 = vmov 3   ;;  %v2079_v9 = vmov 1  }
  0x43   : > { %s355_s17 = scalar_select %p354_p3, %s2160_s9, 1  ;;  %1618 = vmatprep.subr.mxu1 %v2077_v2  ;;  %1603 = vmatprep.subr.mxu0 %v2077_v2  ;;  %v377_v10 = vld [vmem:[#allocation2 + $0x28] sm:$0xff]  ;;  %v411_v11 = vld [vmem:[#allocation5 + $0x18] sm:$0xff]  ;;  %v376_v13 = vld [vmem:[#allocation2 + $0x20] sm:$0xff]  ;;  %v2080_v15 = vmov 4   ;;  %v2081_v18 = vmov 5  }
  0x44   : > { %1619 = vmatpush3.msra.mxu1 %v379_v4  ;;  %1604 = vmatpush3.msra.mxu0 %v413_v6  ;;  %s2493_s0 = sld [smem:[#allocation12_spill]]  ;;  %v410_v14 = vld [vmem:[#allocation5 + $0x10] sm:$0xff]  ;;  %v375_v16 = vld [vmem:[#allocation2 + $0x18] sm:$0xff]  ;;  %v409_v17 = vld [vmem:[#allocation5 + $0x8] sm:$0xff]  ;;  %v2082_v19 = vmov 7   ;;  %vm2083_vm0 = vmmov 0  }
  0x45   : > { %s1468_s20 = sshll.u32 %s355_s17, 3  ;;  %1620 = vmatprep.subr.mxu1 %v2077_v2  ;;  %1605 = vmatprep.subr.mxu0 %v2077_v2  ;;  %v374_v20 = vld [vmem:[#allocation2 + $0x10] sm:$0xff]  ;;  %v408_v21 = vld [vmem:[#allocation5] sm:$0xff]  ;;  %v373_v22 = vld [vmem:[#allocation2 + $0x8] sm:$0xff]  ;;  %v2084_v23 = vmov 6   ;;  %v2085_v24 = vmov 9  }
  0x46   : > { %s361_s26 = scalar_lea.vmem %s2474_s1, %s1468_s20  ;;  %1621 = vmatpush3.msra.mxu1 %v378_v5  ;;  %1606 = vmatpush3.msra.mxu0 %v412_v7  ;;  %v372_v25 = vld [vmem:[#allocation2] sm:$0xff]  ;;  %v2086_v26 = vmov 8   ;;  %v2087_v27 = vmov 14   ;;  %v2088_v28 = vmov 10   ;;  %v2089_v29 = vmov 15   ;;  %v685_v46 = vld [vmem:[#allocation5 + $0x58] sm:$0xff] }
  0x47   : > { %v2244_v3 = vld [vmem:[%s361_s26] sm:$0xff]  ;;  %1622 = vmatprep.subr.mxu1 %v2077_v2  ;;  %1607 = vmatprep.subr.mxu0 %v2077_v2  ;;  %v2090_v30 = vmov 11   ;;  %v2091_v31 = vmov 12   ;;  %v2092_v32 = vmov 13   ;;  %v2292_v34 = vand.u32 127, %v364_v33  ;;  %v576_v49 = vld [vmem:[#allocation2 + $0x78] sm:$0xff] }
  0x48   : > { %395 = vperm.xlu1 %1901, %v2244_v3   ;;  %381 = vperm.xlu0 %1899, %v2244_v3   ;;  %vm488_vm5 = vcmask 523264   ;;  %vm414_vm7 = vcmask 392192   ;;  %v684_v51 = vld [vmem:[#allocation5 + $0x50] sm:$0xff]  ;;  %v683_v54 = vld [vmem:[#allocation5 + $0x48] sm:$0xff]  ;;  %v682_v57 = vld [vmem:[#allocation5 + $0x40] sm:$0xff]  ;;  %s351_s19 = sand.u32 1, %s2060_s28  }
  0x49   : > { %1623 = vmatpush3.msra.mxu1 %v377_v10  ;;  %1608 = vmatpush3.msra.mxu0 %v411_v11  ;;  %v575_v52 = vld [vmem:[#allocation2 + $0x70] sm:$0xff]  ;;  %v574_v55 = vld [vmem:[#allocation2 + $0x68] sm:$0xff]  ;;  %v573_v60 = vld [vmem:[#allocation2 + $0x60] sm:$0xff]  ;;  %s1467_s25 = sshll.u32 %s351_s19, 3  ;;  %s1502_s24 = sshll.u32 %s2160_s9, 7 }
  0x4a   : > { %s357_s18 = scalar_lea.vmem %s2493_s0, %s1468_s20  ;;  %1624 = vmatprep.subr.mxu1 %v2077_v2  ;;  %1609 = vmatprep.subr.mxu0 %v2077_v2  ;;  %v681_v61 = vld [vmem:[#allocation5 + $0x38] sm:$0xff]  ;;  %v571_v5 = vld [vmem:[#allocation2 + $0x50] sm:$0xff]  ;;  %v570_v7 = vld [vmem:[#allocation2 + $0x48] sm:$0xff]  ;;  %s353_s26 = scalar_lea.vmem [#allocation8], %s1467_s25 }
  0x4b   : > { %v2258_v12 = vld [vmem:[%s357_s18] sm:$0xff]  ;;  %1625 = vmatpush3.msra.mxu1 %v376_v13  ;;  %1610 = vmatpush3.msra.mxu0 %v410_v14  ;;  %v572_v63 = vld [vmem:[#allocation2 + $0x58] sm:$0xff]  ;;  %v883_v11 = vld [vmem:[#allocation5 + $0x88] sm:$0xff]  ;;  %s1355_s10 = sshll.u32 %s353_s26, 4  ;;  %s1353_s21 = scalar_lea.hbm %s2481_s8, %s1502_s24  ;;  %s1356_s10 = int_to_ptr.vmem [resolvable:$true] %s1355_s10 }
  0x4c   : > { %1902 = vset.pattern.permute.xlu1 %v2078_v8  ;;  %1900 = vset.pattern.permute.xlu0 %v2079_v9  ;;  %v569_v10 = vld [vmem:[#allocation2 + $0x40] sm:$0xff]  ;;  %v774_v13 = vld [vmem:[#allocation2 + $0xb8] sm:$0xff]  ;;  %v768_v33 = vld [vmem:[#allocation2 + $0x88] sm:$0xff]  ;;  %s1342_s23 = scalar_lea.sflag [#allocation4], %s351_s19  ;;  %s2000_s0 = scalar_lea.vmem %s1356_s10, 128 }
  0x4d   : > { %402 = vperm.xlu1 %1902, %v2244_v3   ;;  %388 = vperm.xlu0 %1900, %v2244_v3   ;;  %v882_v14 = vld [vmem:[#allocation5 + $0x80] sm:$0xff]  ;;  %p2001_p10 = scmp.ne.s32.totalorder %s1356_s10, %s2000_s0  ;;  %p2494_p12 = scmp.ne.s32.totalorder %s2485_s15, 0 }
  0x4e   : > { %1626 = vmatprep.subr.mxu1 %v2077_v2  ;;  %1611 = vmatprep.subr.mxu0 %v2077_v2  ;;  %s2093_s12 = smov [#allocation8]  }
  0x4f   : > { %1627 = vmatpush3.msra.mxu1 %v375_v16  ;;  %1612 = vmatpush3.msra.mxu0 %v409_v17  ;;  %v773_v17 = vld [vmem:[#allocation2 + $0xb0] sm:$0xff]  ;;  %p2002_p2 = pnand %p2001_p10, %p2494_p12  ;;  %s2004_s17 = sshll.u32 %s2093_s12, 4  ;;  %s2005_s17 = int_to_ptr.vmem [resolvable:$false] %s2004_s17 }
  0x50   : > { %1628 = vmatprep.subr.mxu1 %v2077_v2  ;;  %1613 = vmatprep.subr.mxu0 %v2077_v2  ;;  %s2006_s9 = scalar_lea.vmem %s2005_s17, 256  ;;  %p2007_p7 = scmp.lt.s32.totalorder %s1356_s10, %s2005_s17 }
  0x51   : > { %1903 = vset.pattern.permute.xlu1 %v2076_v1  ;;  %1904 = vset.pattern.permute.xlu0 %v2080_v15  ;;  %v680_v1 = vld [vmem:[#allocation5 + $0x30] sm:$0xff]  ;;  %p2003_p4 = pneg %p2002_p2  ;;  %p2008_p8 = scmp.lt.s32.totalorder %s2006_s9, %s2000_s0 }
  0x52   : > { %367 = vperm.xlu1 %1903, %v2258_v12   ;;  %652 = vperm.xlu0 %1904, %v2244_v3  }
  0x53   : > { %1629 = vmatpush3.msra.mxu1 %v374_v20  ;;  %1614 = vmatpush3.msra.mxu0 %v408_v21  ;;  %v880_v20 = vld [vmem:[#allocation5 + $0x70] sm:$0xff]  ;;  %v771_v21 = vld [vmem:[#allocation2 + $0xa0] sm:$0xff]  ;;  %p2009_p11 = por %p2008_p8, %p2007_p7 }
  0x54   : > { %1630 = vmatprep.subr.mxu1 %v2077_v2  ;;  %1634 = vmatprep.mubr.msk.f32.mxu1 %vm2083_vm0, %v2077_v2 }
  0x55   : > { %1631 = vmatpush3.msra.mxu1 %v373_v22  ;;  %1615 = vmatprep.mubr.msk.f32.mxu0 %vm2083_vm0, %v2077_v2  ;;  %p2010_p0 = pnand %p2009_p11, %p2003_p4 }
  0x56   : > { %1905 = vset.pattern.permute.xlu1 %v2081_v18  ;;  %1907 = vset.pattern.permute.xlu0 %v2082_v19  ;;  %v881_v18 = vld [vmem:[#allocation5 + $0x78] sm:$0xff]  ;;  %v772_v19 = vld [vmem:[#allocation2 + $0xa8] sm:$0xff] }
  0x57   : > { %659 = vperm.xlu1 %1905, %v2244_v3   ;;  %673 = vperm.xlu0 %1907, %v2244_v3  }
  0x58   : > { %1632 = vmatprep.subr.mxu1 %v2077_v2  ;;  %1637 = vmatprep.subr.mxu0 %v2077_v2 }
  0x59   : > { %1633 = vmatpush3.msra.mxu1 %v372_v25 }
  0x5a   : > { %1656 = vmatprep.subr.mxu1 %v2077_v2 }
  0x5b   : > { %1906 = vset.pattern.permute.xlu1 %v2084_v23  ;;  %1910 = vset.pattern.permute.xlu0 %v2085_v24  ;;  %v879_v23 = vld [vmem:[#allocation5 + $0x68] sm:$0xff] }
  0x5c   : > { %666 = vperm.xlu1 %1906, %v2244_v3   ;;  %857 = vperm.xlu0 %1910, %v2244_v3  }
  0x60   : > { %1908 = vset.pattern.permute.xlu1 %v2079_v9  ;;  %1913 = vset.pattern.permute.xlu0 %v2075_v0 }
  0x61   : > { %563 = vperm.xlu1 %1908, %v2258_v12   ;;  %761 = vperm.xlu0 %1913, %v2258_v12  }
  0x65   : > { %1909 = vset.pattern.permute.xlu1 %v2086_v26  ;;  %1916 = vset.pattern.permute.xlu0 %v2087_v27  ;;  %v770_v26 = vld [vmem:[#allocation2 + $0x98] sm:$0xff] }
  0x66   : > { %850 = vperm.xlu1 %1909, %v2244_v3   ;;  %1062 = vperm.xlu0 %1916, %v2244_v3  }
  0x6a   : > { %1911 = vset.pattern.permute.xlu1 %v2088_v28  ;;  %1919 = vset.pattern.permute.xlu0 %v2089_v29  ;;  %v878_v28 = vld [vmem:[#allocation5 + $0x60] sm:$0xff] }
  0x6b   : > { %864 = vperm.xlu1 %1911, %v2244_v3  }
  0x6f   : > { %1912 = vset.pattern.permute.xlu1 %v2090_v30  ;;  %v769_v30 = vld [vmem:[#allocation2 + $0x90] sm:$0xff] }
  0x70   : > { %871 = vperm.xlu1 %1912, %v2244_v3  }
  0x74   : > { %1914 = vset.pattern.permute.xlu1 %v2091_v31 }
  0x75   : > { %1048 = vperm.xlu1 %1914, %v2244_v3  }
  0x79   : > { %1915 = vset.pattern.permute.xlu1 %v2092_v32 }
  0x7a   : > { %1055 = vperm.xlu1 %1915, %v2244_v3  }
  0x7e   : > { %1917 = vset.pattern.permute.xlu1 %v2078_v8 }
  0x7f   : > { %959 = vperm.xlu1 %1917, %v2258_v12  }
  0x83   : > { %1918 = vset.pattern.permute.xlu1 %v2089_v29 }
  0x84   : > { %1069 = vperm.xlu1 %1918, %v2244_v3  }
  0xc3   : > { %v396_v35 = vpop.permute.xlu1 %395  ;;  %v382_v36 = vpop.permute.xlu0 %381 }
  0xc4   : > { %vm383_vm1 = vcmp.eq.s32.totalorder %v382_v36, %v2292_v34  ;;  %vm397_vm2 = vcmp.eq.s32.totalorder %v396_v35, %v2292_v34 }
  0xc5   : > { %v1471_v37 = vsel %vm383_vm1, 1.0, %v2077_v2  ;;  %v1473_v42 = vsel %vm397_vm2, 1.0, %v2077_v2 }
  0xc8   : > { %v403_v38 = vpop.permute.xlu1 %402  ;;  %v389_v39 = vpop.permute.xlu0 %388 }
  0xc9   : > { %vm390_vm3 = vcmp.eq.s32.totalorder %v389_v39, %v2292_v34  ;;  %vm404_vm4 = vcmp.eq.s32.totalorder %v403_v38, %v2292_v34 }
  0xca   : > { %v1472_v40 = vsel %vm390_vm3, 1.0, %v2077_v2  ;;  %v1474_v45 = vsel %vm404_vm4, 1.0, %v2077_v2 }
  0xcb   : > { %v393_v41 = vadd.f32 %v1472_v40, %v1471_v37  ;;  %v767_v37 = vld [vmem:[#allocation2 + $0x80] sm:$0xff]  ;;  %v972_v40 = vld [vmem:[#allocation2 + $0xf8] sm:$0xff] }
  0xcd   : > { %v400_v43 = vadd.f32 %v1473_v42, %v393_v41  ;;  %v368_v44 = vpop.permute.xlu1 %367  ;;  %v653_v50 = vpop.permute.xlu0 %652  ;;  %v971_v42 = vld [vmem:[#allocation2 + $0xf0] sm:$0xff] }
  0xce   : > { %vm369_vm6 = vcmp.eq.s32.totalorder %v368_v44, %v2292_v34  ;;  %vm654_vm8 = vcmp.eq.s32.totalorder %v653_v50, %v2292_v34  ;;  %v970_v44 = vld [vmem:[#allocation2 + $0xe8] sm:$0xff] }
  0xcf   : > { %v407_v47 = vadd.f32 %v1474_v45, %v400_v43  ;;  %v1470_v48 = vsel %vm369_vm6, 1.0, %v2077_v2  ;;  %v1479_v58 = vsel %vm654_vm8, 1.0, %v2077_v2  ;;  %v1081_v43 = vld [vmem:[#allocation5 + $0xb8] sm:$0xff]  ;;  %v1080_v45 = vld [vmem:[#allocation5 + $0xb0] sm:$0xff] }
  0xd0   : > { %1635 = vmatmul.mubr.msk.f32.vlgmr.msra.gmra.mxu1 %vm488_vm5, %v1470_v48 }
  0xd1   : > { %1616 = vmatmul.mubr.msk.f32.vlgmr.msra.gmra.mxu0 %vm414_vm7, %v407_v47  ;;  %1657 = vmatpush3.msra.mxu1 %v685_v46  ;;  %v969_v46 = vld [vmem:[#allocation2 + $0xe0] sm:$0xff]  ;;  %v1079_v47 = vld [vmem:[#allocation5 + $0xa8] sm:$0xff] }
  0xd2   : > { %1638 = vmatpush3.msra.mxu0 %v576_v49  ;;  %v660_v53 = vpop.permute.xlu1 %659  ;;  %1658 = vmatprep.subr.mxu1 %v2077_v2  ;;  %v674_v56 = vpop.permute.xlu0 %673  ;;  %v968_v49 = vld [vmem:[#allocation2 + $0xd8] sm:$0xff] }
  0xd3   : > { %1639 = vmatprep.subr.mxu0 %v2077_v2  ;;  %vm661_vm9 = vcmp.eq.s32.totalorder %v660_v53, %v2292_v34  ;;  %1659 = vmatpush3.msra.mxu1 %v684_v51  ;;  %vm675_vm10 = vcmp.eq.s32.totalorder %v674_v56, %v2292_v34  ;;  %v1078_v51 = vld [vmem:[#allocation5 + $0xa0] sm:$0xff]  ;;  %v966_v56 = vld [vmem:[#allocation2 + $0xc8] sm:$0xff] }
  0xd4   : > { %1640 = vmatpush3.msra.mxu0 %v575_v52  ;;  %1660 = vmatprep.subr.mxu1 %v2077_v2  ;;  %v1480_v59 = vsel %vm661_vm9, 1.0, %v2077_v2  ;;  %v1482_v4 = vsel %vm675_vm10, 1.0, %v2077_v2  ;;  %v967_v52 = vld [vmem:[#allocation2 + $0xd0] sm:$0xff] }
  0xd5   : > { %1641 = vmatprep.subr.mxu0 %v2077_v2  ;;  %1661 = vmatpush3.msra.mxu1 %v683_v54  ;;  %v664_v0 = vadd.f32 %v1480_v59, %v1479_v58  ;;  %v1077_v54 = vld [vmem:[#allocation5 + $0x98] sm:$0xff]  ;;  %v1076_v58 = vld [vmem:[#allocation5 + $0x90] sm:$0xff] }
  0xd6   : > { %1642 = vmatpush3.msra.mxu0 %v574_v55  ;;  %1662 = vmatprep.subr.mxu1 %v2077_v2 }
  0xd7   : > { %1643 = vmatprep.subr.mxu0 %v2077_v2  ;;  %v667_v62 = vpop.permute.xlu1 %666  ;;  %1663 = vmatpush3.msra.mxu1 %v682_v57  ;;  %v858_v15 = vpop.permute.xlu0 %857 }
  0xd8   : > { %1644 = vmatpush3.msra.mxu0 %v573_v60  ;;  %vm668_vm11 = vcmp.eq.s32.totalorder %v667_v62, %v2292_v34  ;;  %1664 = vmatprep.subr.mxu1 %v2077_v2  ;;  %vm859_vm13 = vcmp.eq.s32.totalorder %v858_v15, %v2292_v34  ;;  %v965_v60 = vld [vmem:[#allocation2 + $0xc0] sm:$0xff]  ;;  %v1167_v15 = vld [vmem:[#allocation7 + $0x18] sm:$0xff] }
  0xd9   : > { %v1481_v3 = vsel %vm668_vm11, 1.0, %v2077_v2  ;;  %1645 = vmatprep.subr.mxu0 %v2077_v2  ;;  %1665 = vmatpush3.msra.mxu1 %v681_v61  ;;  %v1487_v24 = vsel %vm859_vm13, 1.0, %v2077_v2 }
  0xda   : > { %v671_v6 = vadd.f32 %v1481_v3, %v664_v0  ;;  %1646 = vmatpush3.msra.mxu0 %v572_v63  ;;  %1666 = vmatprep.subr.mxu1 %v2077_v2 }
  0xdb   : > { %1647 = vmatprep.subr.mxu0 %v2077_v2  ;;  %1667 = vmatpush3.msra.mxu1 %v680_v1 }
  0xdc   : > { %v678_v8 = vadd.f32 %v1482_v4, %v671_v6  ;;  %1648 = vmatpush3.msra.mxu0 %v571_v5  ;;  %v564_v9 = vpop.permute.xlu1 %563  ;;  %1668 = vmatprep.mubr.msk.f32.mxu1 %vm2083_vm0, %v2077_v2  ;;  %v762_v27 = vpop.permute.xlu0 %761  ;;  %v1179_v4 = vld [vmem:[#allocation7 + $0x78] sm:$0xff]  ;;  %v1178_v5 = vld [vmem:[#allocation7 + $0x70] sm:$0xff]  ;;  %v1176_v6 = vld [vmem:[#allocation7 + $0x60] sm:$0xff] }
  0xdd   : > { %1649 = vmatprep.subr.mxu0 %v2077_v2  ;;  %vm565_vm12 = vcmp.eq.s32.totalorder %v564_v9, %v2292_v34  ;;  %1653 = vmatprep.mubr.msk.f32.mxu0 %vm2083_vm0, %v2077_v2  ;;  %vm763_vm1 = vcmp.eq.s32.totalorder %v762_v27, %v2292_v34  ;;  %v1173_v9 = vld [vmem:[#allocation7 + $0x48] sm:$0xff] }
  0xde   : > { %v1477_v12 = vsel %vm565_vm12, 1.0, %v2077_v2  ;;  %1650 = vmatpush3.msra.mxu0 %v570_v7  ;;  %1669 = vmatmul.mubr.msk.f32.vlgmr.msra.gmra.mxu1 %vm414_vm7, %v678_v8  ;;  %v1484_v39 = vsel %vm763_vm1, 1.0, %v2077_v2  ;;  %v1175_v7 = vld [vmem:[#allocation7 + $0x58] sm:$0xff]  ;;  %v1174_v8 = vld [vmem:[#allocation7 + $0x50] sm:$0xff] }
  0xdf   : > { %1651 = vmatprep.subr.mxu0 %v2077_v2  ;;  %1690 = vmatprep.subr.mxu1 %v2077_v2 }
  0xe0   : > { %1652 = vmatpush3.msra.mxu0 %v569_v10  ;;  %1691 = vmatpush3.msra.mxu1 %v883_v11  ;;  %v1172_v10 = vld [vmem:[#allocation7 + $0x40] sm:$0xff]  ;;  %v1171_v11 = vld [vmem:[#allocation7 + $0x38] sm:$0xff] }
  0xe1   : > { %1654 = vmatmul.mubr.msk.f32.vlgmr.msra.gmra.mxu0 %vm488_vm5, %v1477_v12  ;;  %1671 = vmatprep.subr.mxu0 %v2077_v2  ;;  %v851_v16 = vpop.permute.xlu1 %850  ;;  %v1063_v50 = vpop.permute.xlu0 %1062  ;;  %v1170_v12 = vld [vmem:[#allocation7 + $0x30] sm:$0xff] }
  0xe2   : > { %1672 = vmatpush3.msra.mxu0 %v774_v13  ;;  %1692 = vmatprep.subr.mxu1 %v2077_v2  ;;  %vm852_vm14 = vcmp.eq.s32.totalorder %v851_v16, %v2292_v34  ;;  %vm1064_vm6 = vcmp.eq.s32.totalorder %v1063_v50, %v2292_v34  ;;  %v1169_v13 = vld [vmem:[#allocation7 + $0x28] sm:$0xff]  ;;  %v1166_v16 = vld [vmem:[#allocation7 + $0x10] sm:$0xff] }
  0xe3   : > { %1673 = vmatprep.subr.mxu0 %v2077_v2  ;;  %1693 = vmatpush3.msra.mxu1 %v882_v14  ;;  %v1486_v25 = vsel %vm852_vm14, 1.0, %v2077_v2  ;;  %v1495_v61 = vsel %vm1064_vm6, 1.0, %v2077_v2  ;;  %v1168_v14 = vld [vmem:[#allocation7 + $0x20] sm:$0xff] }
  0xe4   : > { %1674 = vmatpush3.msra.mxu0 %v773_v17  ;;  %1694 = vmatprep.subr.mxu1 %v2077_v2  ;;  %v862_v31 = vadd.f32 %v1487_v24, %v1486_v25  ;;  %v1165_v17 = vld [vmem:[#allocation7 + $0x8] sm:$0xff] }
  0xe5   : > { %1675 = vmatprep.subr.mxu0 %v2077_v2  ;;  %1695 = vmatpush3.msra.mxu1 %v881_v18  ;;  %v1164_v18 = vld [vmem:[#allocation7] sm:$0xff] }
  0xe6   : > { %1676 = vmatpush3.msra.mxu0 %v772_v19  ;;  %v865_v22 = vpop.permute.xlu1 %864  ;;  %1696 = vmatprep.subr.mxu1 %v2077_v2 }
  0xe7   : > { %1677 = vmatprep.subr.mxu0 %v2077_v2  ;;  %vm866_vm15 = vcmp.eq.s32.totalorder %v865_v22, %v2292_v34  ;;  %1697 = vmatpush3.msra.mxu1 %v880_v20 }
  0xe8   : > { %1678 = vmatpush3.msra.mxu0 %v771_v21  ;;  %1698 = vmatprep.subr.mxu1 %v2077_v2  ;;  %v1488_v29 = vsel %vm866_vm15, 1.0, %v2077_v2 }
  0xe9   : > { %1679 = vmatprep.subr.mxu0 %v2077_v2  ;;  %1699 = vmatpush3.msra.mxu1 %v879_v23  ;;  %v869_v35 = vadd.f32 %v1488_v29, %v862_v31 }
  0xea   : > { %1680 = vmatpush3.msra.mxu0 %v770_v26  ;;  %1700 = vmatprep.subr.mxu1 %v2077_v2 }
  0xeb   : > { %1681 = vmatprep.subr.mxu0 %v2077_v2  ;;  %v872_v32 = vpop.permute.xlu1 %871  ;;  %1701 = vmatpush3.msra.mxu1 %v878_v28 }
  0xec   : > { %1682 = vmatpush3.msra.mxu0 %v769_v30  ;;  %vm873_vm2 = vcmp.eq.s32.totalorder %v872_v32, %v2292_v34  ;;  %1687 = vmatprep.mubr.msk.f32.mxu0 %vm2083_vm0, %v2077_v2 }
  0xed   : > { %v1489_v36 = vsel %vm873_vm2, 1.0, %v2077_v2  ;;  %1683 = vmatprep.subr.mxu0 %v2077_v2  ;;  %1702 = vmatprep.mubr.msk.f32.mxu1 %vm2083_vm0, %v2077_v2 }
  0xee   : > { %v876_v38 = vadd.f32 %v1489_v36, %v869_v35  ;;  %1684 = vmatpush3.msra.mxu0 %v768_v33  ;;  %1705 = vmatprep.subr.mxu1 %v2077_v2 }
  0xef   : > { %1685 = vmatprep.subr.mxu0 %v2077_v2 }
  0xf0   : > { %1686 = vmatpush3.msra.mxu0 %v767_v37  ;;  %1703 = vmatmul.mubr.msk.f32.vlgmr.msra.gmra.mxu1 %vm414_vm7, %v876_v38  ;;  %v1049_v41 = vpop.permute.xlu1 %1048 }
  0xf1   : > { %1688 = vmatmul.mubr.msk.f32.vlgmr.msra.gmra.mxu0 %vm488_vm5, %v1484_v39  ;;  %1706 = vmatpush3.msra.mxu1 %v972_v40  ;;  %vm1050_vm4 = vcmp.eq.s32.totalorder %v1049_v41, %v2292_v34  ;;  %v1498_v40 = vld [vmem:[%s2478_s5] ss:$0 sm:$0xff] }
  0xf2   : > { %1707 = vmatprep.subr.mxu1 %v2077_v2  ;;  %1724 = vmatprep.subr.mxu0 %v2077_v2  ;;  %v1493_v57 = vsel %vm1050_vm4, 1.0, %v2077_v2 }
  0xf3   : > { %1708 = vmatpush3.msra.mxu1 %v971_v42  ;;  %1725 = vmatpush3.msra.mxu0 %v1081_v43 }
  0xf4   : > { %1709 = vmatprep.subr.mxu1 %v2077_v2  ;;  %1726 = vmatprep.subr.mxu0 %v2077_v2 }
  0xf5   : > { %1710 = vmatpush3.msra.mxu1 %v970_v44  ;;  %v1056_v48 = vpop.permute.xlu1 %1055  ;;  %1727 = vmatpush3.msra.mxu0 %v1080_v45 }
  0xf6   : > { %1711 = vmatprep.subr.mxu1 %v2077_v2  ;;  %vm1057_vm3 = vcmp.eq.s32.totalorder %v1056_v48, %v2292_v34  ;;  %1728 = vmatprep.subr.mxu0 %v2077_v2 }
  0xf7   : > { %1712 = vmatpush3.msra.mxu1 %v969_v46  ;;  %1729 = vmatpush3.msra.mxu0 %v1079_v47  ;;  %v1494_v53 = vsel %vm1057_vm3, 1.0, %v2077_v2 }
  0xf8   : > { %1713 = vmatprep.subr.mxu1 %v2077_v2  ;;  %1721 = vmatprep.mubr.msk.f32.mxu1 %vm2083_vm0, %v2077_v2  ;;  %v1060_v59 = vadd.f32 %v1494_v53, %v1493_v57 }
  0xf9   : > { %1714 = vmatpush3.msra.mxu1 %v968_v49  ;;  %1730 = vmatprep.subr.mxu0 %v2077_v2 }
  0xfa   : > { %1715 = vmatprep.subr.mxu1 %v2077_v2  ;;  %v960_v55 = vpop.permute.xlu1 %959  ;;  %1731 = vmatpush3.msra.mxu0 %v1078_v51  ;;  %v1067_v0 = vadd.f32 %v1495_v61, %v1060_v59 }
  0xfb   : > { %1716 = vmatpush3.msra.mxu1 %v967_v52  ;;  %1732 = vmatprep.subr.mxu0 %v2077_v2  ;;  %vm961_vm8 = vcmp.eq.s32.totalorder %v960_v55, %v2292_v34  ;;  %v1499_v52 = vld [vmem:[%s2479_s6] ss:$0 sm:$0xff] }
  0xfc   : > { %1717 = vmatprep.subr.mxu1 %v2077_v2  ;;  %1733 = vmatpush3.msra.mxu0 %v1077_v54  ;;  %v1491_v62 = vsel %vm961_vm8, 1.0, %v2077_v2  ;;  %v1500_v54 = vld [vmem:[%s2480_s7] ss:$0 sm:$0xff] }
  0xfd   : > { %1718 = vmatpush3.msra.mxu1 %v966_v56  ;;  %1734 = vmatprep.subr.mxu0 %v2077_v2 }
  0xfe   : > { %1719 = vmatprep.subr.mxu1 %v2077_v2  ;;  %1735 = vmatpush3.msra.mxu0 %v1076_v58 }
  0xff   : > { %1720 = vmatpush3.msra.mxu1 %v965_v60  ;;  %v1070_v63 = vpop.permute.xlu1 %1069  ;;  %1736 = vmatprep.mubr.msk.f32.mxu0 %vm2083_vm0, %v2077_v2 }
 0x100   : > { %1722 = vmatmul.mubr.msk.f32.vlgmr.msra.gmra.mxu1 %vm488_vm5, %v1491_v62  ;;  %vm1071_vm9 = vcmp.eq.s32.totalorder %v1070_v63, %v2292_v34  ;;  %1739 = vmatprep.subr.mxu0 %v2077_v2  ;;  %v1177_v34 = vld [vmem:[#allocation7 + $0x68] sm:$0xff] }
 0x101   : > { %v1496_v1 = vsel %vm1071_vm9, 1.0, %v2077_v2  ;;  %1774 = vmatprep.subr.mxu1 %v2077_v2  ;;  %1806 = vmatprep.mubr.msk.f32.mxu1 %vm2083_vm0, %v2077_v2 }
 0x102   : > { %v1074_v3 = vadd.f32 %v1496_v1, %v1067_v0  ;;  %1775 = vmatpush3.msra.mxu1 %v1179_v4 }
 0x103   : > { %1776 = vmatprep.subr.mxu1 %v2077_v2 }
 0x104   : > { %1737 = vmatmul.mubr.msk.f32.vlgmr.msra.gmra.mxu0 %vm414_vm7, %v1074_v3  ;;  %1777 = vmatpush3.msra.mxu1 %v1178_v5 }
 0x105   : > { %1771 = vmatprep.mubr.msk.f32.mxu0 %vm2083_vm0, %v2077_v2  ;;  %1740 = vmatpush3.msra.mxu0 %v1179_v4 }
 0x106   : > { %1741 = vmatprep.subr.mxu0 %v2077_v2  ;;  %1778 = vmatprep.subr.mxu1 %v2077_v2 }
 0x107   : > { %1742 = vmatpush3.msra.mxu0 %v1178_v5  ;;  %1779 = vmatpush3.msra.mxu1 %v1177_v34 }
 0x108   : > { %1743 = vmatprep.subr.mxu0 %v2077_v2  ;;  %1780 = vmatprep.subr.mxu1 %v2077_v2 }
 0x109   : > { %1744 = vmatpush3.msra.mxu0 %v1177_v34  ;;  %1781 = vmatpush3.msra.mxu1 %v1176_v6 }
 0x10a   : > { %1745 = vmatprep.subr.mxu0 %v2077_v2  ;;  %1782 = vmatprep.subr.mxu1 %v2077_v2 }
 0x10b   : > { %1746 = vmatpush3.msra.mxu0 %v1176_v6  ;;  %1783 = vmatpush3.msra.mxu1 %v1175_v7 }
 0x10c   : > { %1747 = vmatprep.subr.mxu0 %v2077_v2  ;;  %1784 = vmatprep.subr.mxu1 %v2077_v2 }
 0x10d   : > { %1748 = vmatpush3.msra.mxu0 %v1175_v7  ;;  %1785 = vmatpush3.msra.mxu1 %v1174_v8 }
 0x10e   : > { %1749 = vmatprep.subr.mxu0 %v2077_v2  ;;  %1786 = vmatprep.subr.mxu1 %v2077_v2 }
 0x10f   : > { %1750 = vmatpush3.msra.mxu0 %v1174_v8  ;;  %1787 = vmatpush3.msra.mxu1 %v1173_v9 }
 0x110   : > { %1751 = vmatprep.subr.mxu0 %v2077_v2  ;;  %1788 = vmatprep.subr.mxu1 %v2077_v2 }
 0x111   : > { %1752 = vmatpush3.msra.mxu0 %v1173_v9  ;;  %1789 = vmatpush3.msra.mxu1 %v1172_v10 }
 0x112   : > { %1753 = vmatprep.subr.mxu0 %v2077_v2  ;;  %1790 = vmatprep.subr.mxu1 %v2077_v2 }
 0x113   : > { %1754 = vmatpush3.msra.mxu0 %v1172_v10  ;;  %1791 = vmatpush3.msra.mxu1 %v1171_v11 }
 0x114   : > { %1755 = vmatprep.subr.mxu0 %v2077_v2  ;;  %1792 = vmatprep.subr.mxu1 %v2077_v2 }
 0x115   : > { %1756 = vmatpush3.msra.mxu0 %v1171_v11  ;;  %1793 = vmatpush3.msra.mxu1 %v1170_v12 }
 0x116   : > { %1757 = vmatprep.subr.mxu0 %v2077_v2  ;;  %1794 = vmatprep.subr.mxu1 %v2077_v2 }
 0x117   : > { %1758 = vmatpush3.msra.mxu0 %v1170_v12  ;;  %1795 = vmatpush3.msra.mxu1 %v1169_v13 }
 0x118   : > { %1759 = vmatprep.subr.mxu0 %v2077_v2  ;;  %1796 = vmatprep.subr.mxu1 %v2077_v2 }
 0x119   : > { %1760 = vmatpush3.msra.mxu0 %v1169_v13  ;;  %1797 = vmatpush3.msra.mxu1 %v1168_v14 }
 0x11a   : > { %1761 = vmatprep.subr.mxu0 %v2077_v2  ;;  %1798 = vmatprep.subr.mxu1 %v2077_v2 }
 0x11b   : > { %1762 = vmatpush3.msra.mxu0 %v1168_v14  ;;  %1799 = vmatpush3.msra.mxu1 %v1167_v15 }
 0x11c   : > { %1763 = vmatprep.subr.mxu0 %v2077_v2  ;;  %1800 = vmatprep.subr.mxu1 %v2077_v2 }
 0x11d   : > { %1764 = vmatpush3.msra.mxu0 %v1167_v15  ;;  %1801 = vmatpush3.msra.mxu1 %v1166_v16 }
 0x11e   : > { %1765 = vmatprep.subr.mxu0 %v2077_v2  ;;  %1802 = vmatprep.subr.mxu1 %v2077_v2 }
 0x11f   : > { %1766 = vmatpush3.msra.mxu0 %v1166_v16  ;;  %1803 = vmatpush3.msra.mxu1 %v1165_v17 }
 0x120   : > { %1767 = vmatprep.subr.mxu0 %v2077_v2  ;;  %1804 = vmatprep.subr.mxu1 %v2077_v2 }
 0x121   : > { %1768 = vmatpush3.msra.mxu0 %v1165_v17  ;;  %1805 = vmatpush3.msra.mxu1 %v1164_v18 }
 0x122   : > { %1769 = vmatprep.subr.mxu0 %v2077_v2 }
 0x123   : > { %1770 = vmatpush3.msra.mxu0 %v1164_v18 }
 0x190   : > { %v558_v19 = vpop.f32.mrf.mxu1 }
 0x191   : > { %v484_v20 = vpop.f32.mrf.mxu0 }
 0x192   : > { %v1636_v21 = vpop.f32.mrf.mxu1  ;;  %v559_v31 = vadd.f32 %v558_v19, %v484_v20 }
 0x193   : > { %v1617_v22 = vpop.f32.mrf.mxu0 }
 0x19e   : > { %v755_v23 = vpop.f32.mrf.mxu1 }
 0x1a0   : > { %v1670_v24 = vpop.f32.mrf.mxu1 }
 0x1a1   : > { %v646_v25 = vpop.f32.mrf.mxu0 }
 0x1a2   : > { %v650_v32 = vadd.f32 %v646_v25, %v559_v31 }
 0x1a3   : > { %v1655_v26 = vpop.f32.mrf.mxu0 }
 0x1a4   : > { %v759_v33 = vadd.f32 %v755_v23, %v650_v32 }
 0x1b0   : > { %v953_v27 = vpop.f32.mrf.mxu1 }
 0x1b1   : > { %v844_v28 = vpop.f32.mrf.mxu0 }
 0x1b2   : > { %v1704_v29 = vpop.f32.mrf.mxu1  ;;  %v848_v35 = vadd.f32 %v844_v28, %v759_v33 }
 0x1b3   : > { %v1689_v30 = vpop.f32.mrf.mxu0 }
 0x1b4   : > { %v957_v2 = vadd.f32 %v953_v27, %v848_v35 }
 0x1c0   : > { %v1042_v36 = vpop.f32.mrf.mxu1 }
 0x1c1   : > { %v1046_v38 = vadd.f32 %v1042_v36, %v957_v2 }
 0x1c2   : > { %v1723_v37 = vpop.f32.mrf.mxu1 }
 0x1c4   : > { %v1151_v39 = vpop.f32.mrf.mxu0 }
 0x1c5   : > { %v1155_v41 = vadd.f32 %v1151_v39, %v1046_v38 }
 0x1c6   : > { %v1738_v42 = vpop.f32.mrf.mxu0 }
 0x1c7   : > { %v1163_v43 = vadd.f32 %v1498_v40, %v1155_v41 }
 0x1c9   : > { %1772 = vmatmul.mubr.f32.vlgmr.msra.gmra.mxu0 %v1163_v43 }
 0x289   : > { %v1246_v44 = vpop.f32.mrf.mxu0 }
 0x28a   : > { %v1250_v45 = vsub.f32 %v1163_v43, %v1246_v44 }
 0x28b   : > { %v1773_v46 = vpop.f32.mrf.mxu0 }
 0x28c   : > { %v1251_v47 = vmul.f32 %v1250_v45, %v1250_v45 }
 0x28e   : > { %1807 = vmatmul.mubr.f32.vlgmr.msra.gmra.mxu1 %v1251_v47 }
 0x34e   : > { %v1318_v48 = vpop.f32.mrf.mxu1 }
 0x34f   : > { %v1319_v49 = vadd.f32 1e-05, %v1318_v48 }
 0x350   : > { %v1808_v50 = vpop.f32.mrf.mxu1 }
 0x351   : > { %1920 = vrsqrt.f32 %v1319_v49 }
 0x35e   : > { %v1921_v51 = vpop.eup %1920 }
 0x35f   : > { %v1323_v53 = vmul.f32 %v1921_v51, %v1250_v45 }
 0x361   : > { %v1331_v55 = vmul.f32 %v1499_v52, %v1323_v53 }
 0x363   : > { %v1339_v56 = vadd.f32 %v1500_v54, %v1331_v55 }
 0x365   : > { %1340 = vst [vmem:[%s353_s26] sm:$0xff] %v1339_v56 }
 0x366   : > { %2013 = shalt.err (!%p2010_p0)
}
 0x367   : > { %s2014_s25 = scalar_lea.hbm %s1353_s21, 128  ;;  %s2018_s22 = scalar_lea.hbm %s2481_s8, 256 }
 0x368   : > { %p2015_p6 = scmp.ne.s32.totalorder %s1353_s21, %s2014_s25  ;;  %p2019_p1 = scmp.lt.s32.totalorder %s1353_s21, %s2481_s8 }
 0x369   : > { %p2020_p5 = scmp.lt.s32.totalorder %s2018_s22, %s2014_s25 }
 0x36a   : > { %p2016_p9 = pnand %p2015_p6, %p2494_p12 }
 0x36b   : > { %p2021_p3 = por %p2020_p5, %p2019_p1 }
 0x36c   : > { %p2017_p13 = pneg %p2016_p9 }
 0x36e   : > { %p2022_p10 = pnand %p2021_p3, %p2017_p13 }
 0x370   : > { %2025 = shalt.err (!%p2022_p10)
}
 0x371   : > { %1821 = dma.vmem_to_hbm [thread:$0]  (%p2494_p12), %s1356_s10, 128, %s1353_s21, %s1342_s23  }
 0x372 PF: > { %p1843_p2 = scmp.ge.s32.totalorder %s2068_s30, 2  ;;  %s1367_s0 = sand.u32 1, %s2056_s27  }
 0x373   : > { %p2495_p4 = scmp.ne.s32.totalorder %s2486_s16, 0  ;;  %s1368_s13 = scalar_lea.sflag [#allocation4], %s1367_s0 }
 0x375   : > { %p1834_p7 = pnand %p1843_p2, %p2495_p4 }
 0x377   : > { %p1835_p8 = pneg %p1834_p7 }
 0x379   : > { %2051 = dma.done.wait (%p1835_p8), %s1368_s13, 128  }
 0x37a   : > { %2053 = vsyncadd (%p1835_p8), %s1368_s13, 4294967168  ;;  %p20_p11 = scmp.ge.s32.totalorder %s2164_s11, 4   ;;  %s2496_s27 = smov %s2060_s28 }
 0x37b   : > { %s2497_s28 = smov %s2064_s29  ;;  %s2498_s29 = smov %s2175_s14 }
 0x37c   : > { %s2499_s30 = smov %s2164_s11  ;;  %22 = sbr.rel (!%p20_p11) target bundleno = 7 (0x7), region = 109 }
 0x381   :  { %1373 = vsyncpa [#allocation3], 1 }
 0x382   :  { %1375 = vsyncpa [#allocation3 + $0x1], 1 }
 0x383   :  { %1376 = vsyncpa [#allocation6], 1 }
 0x384   :  { %1377 = vsyncpa [#allocation4], 1 }
 0x385   :  { %1379 = vsyncpa [#allocation4 + $0x1], 1 }

</bundles_post_ra>
